<compile_context>
chip_gen: v7x
topology: tpu7x:2x2x1
jax: 0.10.0
libtpu: 0.0.40
codegen_flags: <defaults>
</compile_context>

<pallas_src>
import jax
import jax.numpy as jnp
from jax.experimental import pallas as pl
from jax.experimental.pallas import tpu as pltpu


def gat_kernel(tok_ref, edge_h_ref, w_tok_ref, a1_ref, out_ref):
    NB, L, Dt = tok_ref.shape          # batch block, seq len, token_dim
    Hp = w_tok_ref.shape[1]            # lane-padded hidden_dim

    # fc as one fused (NB*L, Dt) @ (Dt, Hp) bf16 MXU matmul, f32 accumulate.
    h = jnp.dot(tok_ref[...].reshape(NB * L, Dt), w_tok_ref[...],
                preferred_element_type=jnp.float32).reshape(NB, L, Hp)
    h = h + edge_h_ref[...]            # hoisted (avg_edge @ W_edge) row, f32, broadcast over L

    # Logits e[b,i,j] = a1·h[b,j] + a2·h[b,i] + attn_b.  The i-term and the bias
    # are constant along the softmax axis j -> cancel exactly (no LeakyReLU in
    # the reference forward).  Attention rows are identical, so compute one
    # softmax over j per batch and one weighted sum of h.
    s = jnp.sum(h * a1_ref[...], axis=-1, keepdims=True)             # (NB, L, 1)  f32
    s = s - jnp.max(s, axis=1, keepdims=True)
    p = jnp.exp(s)
    p = p * pl.reciprocal(jnp.sum(p, axis=1, keepdims=True), approx=True)

    row = jnp.sum(p * h, axis=1, keepdims=True)                       # (NB, 1, Hp)
    out_ref[...] = jnp.broadcast_to(row, out_ref.shape).astype(out_ref.dtype)


def gat_layer_pallas(token_embedding, edge_embedding, fc_w, attn_w, attn_b,
                     *, batch_block=1):
    """token_embedding: (B, L, Dt); edge_embedding: (B, E, De);
       fc_w: (H, Dt+De)  [Linear, no bias]; attn_w: (1, 2H); attn_b: (1,)."""
    B, L, Dt = token_embedding.shape
    _, _, De = edge_embedding.shape
    H = fc_w.shape[0]
    NB = batch_block
    assert B % NB == 0, "batch_block must divide B"
    f32, bf16 = jnp.float32, jnp.bfloat16

    # Lane-pad the hidden dim to a multiple of 128 (zero columns are exact no-ops;
    # gives unmasked lane-dense loads/stores and full MXU N-width).
    Hp = ((H + 127) // 128) * 128

    # Split fc weight along the input-feature axis: W = [W_tok | W_edge].
    w_tok = jnp.pad(fc_w[:, :Dt].T.astype(f32), ((0, 0), (0, Hp - H))).astype(bf16)   # (Dt, Hp) bf16
    w_edge = fc_w[:, Dt:].T.astype(f32)                                               # (De, H)

    # Hoist edge mean + its tiny matmul into the wrapper: one (B,1,Hp) f32 row
    # per batch instead of streaming the (B,E,De) edge tensor into the kernel.
    avg_edge = jnp.mean(edge_embedding.astype(f32), axis=1, keepdims=True)            # (B, 1, De)
    edge_h = jnp.einsum('bxd,dh->bxh', avg_edge, w_edge)                              # (B, 1, H)
    edge_h = jnp.pad(edge_h, ((0, 0), (0, 0), (0, Hp - H)))                           # (B, 1, Hp)

    # a1 multiplies h[b, j] (the softmax-axis term).  a2 and attn_b cancel in the
    # softmax and are intentionally not passed to the kernel.
    a1 = jnp.pad(attn_w[0, :H].astype(f32), (0, Hp - H)).reshape(1, 1, Hp)            # (1, 1, Hp)
    del attn_b

    tok_bf16 = token_embedding.astype(bf16)                                           # MXU operand only

    # Per-grid-step VMEM estimate (double-buffered blocks + f32 temporaries);
    # only raise the scoped limit if it would exceed the smallest (v5e) default.
    per_step_bytes = (2 * NB * L * Dt * 2            # tok block (bf16)
                      + 2 * NB * Hp * 4              # edge_h row
                      + 2 * NB * L * Hp * 4          # output block
                      + 2 * (Dt * Hp * 2 + Hp * 4)   # weights + a1
                      + 4 * NB * L * Hp * 4)         # h / p*h / broadcast temporaries
    cparams = dict(dimension_semantics=("parallel",))
    if per_step_bytes > 16 * 1024 * 1024:
        cparams["vmem_limit_bytes"] = int(min(2 * per_step_bytes, 60 * 1024 * 1024))

    out = pl.pallas_call(
        gat_kernel,
        out_shape=jax.ShapeDtypeStruct((B, L, Hp), f32),
        grid_spec=pltpu.PrefetchScalarGridSpec(
            num_scalar_prefetch=0,
            grid=(B // NB,),
            in_specs=[
                pl.BlockSpec((NB, L, Dt), lambda n: (n, 0, 0)),
                pl.BlockSpec((NB, 1, Hp), lambda n: (n, 0, 0)),
                pl.BlockSpec((Dt, Hp), lambda n: (0, 0)),
                pl.BlockSpec((1, 1, Hp), lambda n: (0, 0, 0)),
            ],
            out_specs=pl.BlockSpec((NB, L, Hp), lambda n: (n, 0, 0)),
        ),
        compiler_params=pltpu.CompilerParams(**cparams),
    )(tok_bf16, edge_h, w_tok, a1)

    return out[:, :, :H]


def gat_layer_ref(token_embedding, edge_embedding, fc_w, attn_w, attn_b):
    """Pure-JAX reference mirroring the PyTorch forward exactly (bias included)."""
    B, L, _ = token_embedding.shape
    H = fc_w.shape[0]
    avg = jnp.mean(edge_embedding, axis=1, keepdims=True)            # (B, 1, De)
    combined = jnp.concatenate(
        [token_embedding, jnp.repeat(avg, L, axis=1)], axis=-1)      # (B, L, Dt+De)
    h = combined @ fc_w.T                                            # (B, L, H)
    h_row = jnp.broadcast_to(h[:, None, :, :], (B, L, L, H))         # h[b, j]
    h_col = jnp.broadcast_to(h[:, :, None, :], (B, L, L, H))         # h[b, i]
    concat_h = jnp.concatenate([h_row, h_col], axis=-1)              # (B, L, L, 2H)
    e = jnp.squeeze(concat_h @ attn_w.T, -1) + attn_b[0]             # (B, L, L)
    attn = jax.nn.softmax(e, axis=-1)
    return attn @ h


if __name__ == "__main__":
    B, L, E = 2, 8, 6
    token_dim, edge_dim, hidden_dim = 16, 8, 32

    key = jax.random.PRNGKey(0)
    k_tok, k_edge, k_fc, k_aw, k_ab = jax.random.split(key, 5)

    token_embedding = jax.random.normal(k_tok, (B, L, token_dim), dtype=jnp.float32)
    edge_embedding = jax.random.normal(k_edge, (B, E, edge_dim), dtype=jnp.float32)

    # deterministic parameter init (shapes from the module's __init__)
    fc_w = jax.random.normal(k_fc, (hidden_dim, token_dim + edge_dim),
                             dtype=jnp.float32) * 0.1
    attn_w = jax.random.normal(k_aw, (1, 2 * hidden_dim), dtype=jnp.float32) * 0.1
    attn_b = jax.random.normal(k_ab, (1,), dtype=jnp.float32) * 0.1

    out = gat_layer_pallas(token_embedding, edge_embedding, fc_w, attn_w, attn_b)
    out = jax.block_until_ready(out)

    ref = gat_layer_ref(token_embedding, edge_embedding, fc_w, attn_w, attn_b)
    assert out.shape == (B, L, hidden_dim)
    # tolerance accounts for bf16 MXU operands (f32 accumulate) and the
    # pl.reciprocal(approx=True) softmax normalization
    assert jnp.allclose(out, ref, atol=1e-2, rtol=1e-2), \
        float(jnp.max(jnp.abs(out - ref)))

    print("KERNEL_OK")
</pallas_src>

<mosaic_0001>
module attributes {stable_mosaic.version = 11 : i64} {
  func.func @gat_kernel(%arg0: i32, %arg1: memref<1x8x16xbf16, #tpu.memory_space<vmem>>, %arg2: memref<1x1x128xf32, #tpu.memory_space<vmem>>, %arg3: memref<16x128xbf16, #tpu.memory_space<vmem>>, %arg4: memref<1x1x128xf32, #tpu.memory_space<vmem>>, %arg5: memref<1x8x128xf32, #tpu.memory_space<vmem>>) attributes {dimension_semantics = [#tpu.dimension_semantics<parallel>], iteration_bounds = array<i64: 2>, scalar_prefetch = 0 : i64, scratch_operands = 0 : i64, tpu.core_type = #tpu.core_type<tc>, window_params = [{transform_indices = @transform_0, window_bounds = array<i64: 1, 8, 16>}, {transform_indices = @transform_1, window_bounds = array<i64: 1, 1, 128>}, {pipeline_mode = #tpu.pipeline_mode<synchronous>, transform_indices = @transform_2, window_bounds = array<i64: 16, 128>}, {pipeline_mode = #tpu.pipeline_mode<synchronous>, transform_indices = @transform_3, window_bounds = array<i64: 1, 1, 128>}, {transform_indices = @transform_4, window_bounds = array<i64: 1, 8, 128>}]} {
    %c0 = arith.constant 0 : index
    %c0_0 = arith.constant 0 : index
    %c0_1 = arith.constant 0 : index
    %0 = vector.load %arg1[%c0, %c0_0, %c0_1] : memref<1x8x16xbf16, #tpu.memory_space<vmem>>, vector<1x8x16xbf16>
    %1 = vector.shape_cast %0 : vector<1x8x16xbf16> to vector<8x16xbf16>
    %c0_2 = arith.constant 0 : index
    %c0_3 = arith.constant 0 : index
    %2 = vector.load %arg3[%c0_2, %c0_3] : memref<16x128xbf16, #tpu.memory_space<vmem>>, vector<16x128xbf16>
    %cst = arith.constant dense<0.000000e+00> : vector<8x128xf32>
    %3 = tpu.matmul %1, %2, %cst {dimension_numbers = #tpu.dot_dimension_numbers<[1], [0], [0], [1], [0, 0, 1, 1], [], []>} : vector<8x16xbf16>, vector<16x128xbf16>, vector<8x128xf32> -> vector<8x128xf32>
    %4 = vector.shape_cast %3 : vector<8x128xf32> to vector<1x8x128xf32>
    %c0_4 = arith.constant 0 : index
    %c0_5 = arith.constant 0 : index
    %c0_6 = arith.constant 0 : index
    %5 = vector.load %arg2[%c0_4, %c0_5, %c0_6] : memref<1x1x128xf32, #tpu.memory_space<vmem>>, vector<1x1x128xf32>
    %6 = vector.broadcast %5 : vector<1x1x128xf32> to vector<1x8x128xf32>
    %7 = arith.addf %4, %6 : vector<1x8x128xf32>
    %c0_7 = arith.constant 0 : index
    %c0_8 = arith.constant 0 : index
    %c0_9 = arith.constant 0 : index
    %8 = vector.load %arg4[%c0_7, %c0_8, %c0_9] : memref<1x1x128xf32, #tpu.memory_space<vmem>>, vector<1x1x128xf32>
    %9 = vector.broadcast %8 : vector<1x1x128xf32> to vector<1x8x128xf32>
    %10 = arith.mulf %7, %9 : vector<1x8x128xf32>
    %cst_10 = arith.constant dense<0.000000e+00> : vector<1x8xf32>
    %11 = vector.multi_reduction <add>, %10, %cst_10 [2] : vector<1x8x128xf32> to vector<1x8xf32>
    %12 = vector.shape_cast %11 : vector<1x8xf32> to vector<1x8x1xf32>
    %cst_11 = arith.constant dense<0xFF800000> : vector<1x1xf32>
    %13 = vector.multi_reduction <maximumf>, %12, %cst_11 [1] : vector<1x8x1xf32> to vector<1x1xf32>
    %14 = vector.shape_cast %13 : vector<1x1xf32> to vector<1x1x1xf32>
    %15 = vector.broadcast %14 : vector<1x1x1xf32> to vector<1x8x1xf32>
    %16 = arith.subf %12, %15 : vector<1x8x1xf32>
    %17 = math.exp %16 : vector<1x8x1xf32>
    %cst_12 = arith.constant dense<0.000000e+00> : vector<1x1xf32>
    %18 = vector.multi_reduction <add>, %17, %cst_12 [1] : vector<1x8x1xf32> to vector<1x1xf32>
    %19 = vector.shape_cast %18 : vector<1x1xf32> to vector<1x1x1xf32>
    %20 = tpu.reciprocal %19 {approx = true} : vector<1x1x1xf32> -> vector<1x1x1xf32>
    %21 = vector.broadcast %20 : vector<1x1x1xf32> to vector<1x8x1xf32>
    %22 = arith.mulf %17, %21 : vector<1x8x1xf32>
    %23 = vector.broadcast %22 : vector<1x8x1xf32> to vector<1x8x128xf32>
    %24 = arith.mulf %23, %7 : vector<1x8x128xf32>
    %cst_13 = arith.constant dense<0.000000e+00> : vector<1x128xf32>
    %25 = vector.multi_reduction <add>, %24, %cst_13 [1] : vector<1x8x128xf32> to vector<1x128xf32>
    %26 = vector.shape_cast %25 : vector<1x128xf32> to vector<1x1x128xf32>
    %27 = vector.shape_cast %26 : vector<1x1x128xf32> to vector<1x1x128xf32>
    %28 = vector.broadcast %27 : vector<1x1x128xf32> to vector<1x8x128xf32>
    %c0_14 = arith.constant 0 : index
    %c0_15 = arith.constant 0 : index
    %c0_16 = arith.constant 0 : index
    %29 = vector.load %arg5[%c0_14, %c0_15, %c0_16] : memref<1x8x128xf32, #tpu.memory_space<vmem>>, vector<1x8x128xf32>
    tpu.vector_store %arg5[%c0_14, %c0_15, %c0_16], %28 {strides = array<i32>} : memref<1x8x128xf32, #tpu.memory_space<vmem>>, vector<1x8x128xf32>,
    return
  }
  func.func @transform_0(%arg0: i32) -> (i32, i32, i32) {
    %c0_i32 = arith.constant 0 : i32
    %c0_i32_0 = arith.constant 0 : i32
    %c0_i32_1 = arith.constant 0 : i32
    return %arg0, %c0_i32, %c0_i32_0 : i32, i32, i32
  }
  func.func @transform_1(%arg0: i32) -> (i32, i32, i32) {
    %c0_i32 = arith.constant 0 : i32
    %c0_i32_0 = arith.constant 0 : i32
    %c0_i32_1 = arith.constant 0 : i32
    return %arg0, %c0_i32, %c0_i32_0 : i32, i32, i32
  }
  func.func @transform_2(%arg0: i32) -> (i32, i32) {
    %c0_i32 = arith.constant 0 : i32
    %c0_i32_0 = arith.constant 0 : i32
    %c0_i32_1 = arith.constant 0 : i32
    return %c0_i32, %c0_i32_0 : i32, i32
  }
  func.func @transform_3(%arg0: i32) -> (i32, i32, i32) {
    %c0_i32 = arith.constant 0 : i32
    %c0_i32_0 = arith.constant 0 : i32
    %c0_i32_1 = arith.constant 0 : i32
    %c0_i32_2 = arith.constant 0 : i32
    return %c0_i32, %c0_i32_0, %c0_i32_1 : i32, i32, i32
  }
  func.func @transform_4(%arg0: i32) -> (i32, i32, i32) {
    %c0_i32 = arith.constant 0 : i32
    %c0_i32_0 = arith.constant 0 : i32
    %c0_i32_1 = arith.constant 0 : i32
    return %arg0, %c0_i32, %c0_i32_0 : i32, i32, i32
  }
}

</mosaic_0001>

<bundles_post_ra>
// kernel: tpu_custom_call.1
= control target key start
LH: loop header
LB: loop body
LE: loop exit
PB: predicated region body
PF: predicated region fallthrough
CT: control target
= control target key end

     0   :  { %9 = vsyncpa [#allocation3], 0  ;;  %s901_s0 = inlined_call_operand.hbm [shape: bf16[2,8,16], index: 0, kind: input, shape index: {}]   ;;  %s902_s1 = inlined_call_operand.vmem [shape: f32[2,1,128], index: 1, kind: input, shape index: {}]   ;;  %s903_s2 = inlined_call_operand.hbm [shape: bf16[16,128], index: 2, kind: input, shape index: {}]   ;;  %s904_s3 = inlined_call_operand.vmem [shape: f32[1,1,128], index: 3, kind: input, shape index: {}]   ;;  %s905_s4 = inlined_call_operand.hbm [shape: f32[2,8,128], index: 4, kind: output, shape index: {}]  }
   0x1   :  { %11 = vsyncpa [#allocation3 + $0x1], 0 }
   0x2   :  { %12 = vsyncpa [#allocation6], 0 }
   0x3   :  { %13 = vsyncpa [#allocation4], 0 }
   0x4   :  { %15 = vsyncpa [#allocation4 + $0x1], 0  ;;  %s696_s15 = smov 0   ;;  %s698_s16 = smov 0  }
   0x5   :  { %s700_s17 = smov 0   ;;  %s702_s18 = smov 0  }
   0x6 LB: > { %s717_s19 = sadd.s32 4294967295, %s662_s18   ;;  %s442_s20 = sadd.s32 4294967294, %s662_s18   ;;  %s662_s18 = sphi %s702_s18, %s925_s18   ;;  %s658_s17 = sphi %s700_s17, %s924_s17   ;;  %s654_s16 = sphi %s698_s16, %s923_s16   ;;  %s650_s15 = sphi %s696_s15, %s922_s15  }
   0x7   : > { %p41_p0 = scmp.ne.s32.totalorder %s654_s16, %s650_s15  ;;  %p906_p1 = scmp.eq.s32.totalorder %s717_s19, 0 }
   0x8   : > { %p139_p3 = scmp.eq.s32.totalorder %s442_s20, 1  ;;  %p443_p5 = scmp.ge.s32.totalorder %s662_s18, 1 }
   0x9   : > { %p726_p4 = por %p906_p1, %p41_p0  ;;  %p146_p7 = scmp.lt.s32.totalorder %s662_s18, 3 }
   0xa   : > { %p731_p6 = por %p139_p3, %p41_p0  ;;  %s664_s24 = smov [#allocation5]  }
   0xb   : > { %s909_s21 = scalar_select %p726_p4, 1, 0 }
   0xc   : > { %s910_s22 = scalar_select %p731_p6, 1, 0 }
   0xd   : > { %p736_p8 = pnand %p443_p5, %p146_p7  ;;  %s158_s25 = sshll.u32 %s664_s24, 4  ;;  %s740_s25 = int_to_ptr.vmem [resolvable:$true] %s158_s25 }
   0xe   : > { %s752_s27 = sadd.s32 1, %s662_s18   ;;  %s28_s28 = sadd.s32 1, %s658_s17 }
   0xf   : > { %s911_s23 = scalar_select %p736_p8, 1, 0 }
  0x10   : > { %p476_p9 = pneg %p736_p8  ;;  %s25_s29 = ssub.s32 %s662_s18, %s752_s27 }
  0x11   : > { %s534_s6 = scalar_lea.hbm %s903_s2, 128 }
  0x12   : > { %p747_p11 = pnand %p476_p9, %p906_p1  ;;  %p535_p12 = scmp.ne.s32.totalorder %s903_s2, %s534_s6 }
  0x13   : > { %p541_p5 = scmp.lt.u32.totalorder %s534_s6, %s903_s2 }
  0x14   : > { %p536_p13 = pneg %p747_p11 }
  0x16   : > { %p537_p0 = pnand %p536_p13, %p535_p12 }
  0x18   : > { %p538_p3 = pneg %p537_p0 }
  0x1a   : > { %p543_p7 = pnand %p541_p5, %p538_p3 }
  0x1c   : > { %546 = shalt.err (!%p543_p7)
}
  0x1d   : > { %s547_s11 = scalar_lea.vmem %s740_s25, 128  ;;  %p555_p2 = scmp.lt.s32.totalorder %s740_s25, %s740_s25 }
  0x1e   : > { %p548_p9 = scmp.ne.s32.totalorder %s740_s25, %s547_s11  ;;  %p556_p6 = scmp.lt.s32.totalorder %s547_s11, %s547_s11 }
  0x20   : > { %p550_p10 = pnand %p548_p9, %p536_p13  ;;  %p557_p4 = por %p556_p6, %p555_p2 }
  0x22   : > { %p551_p1 = pneg %p550_p10 }
  0x24   : > { %p558_p8 = pnand %p557_p4, %p551_p1 }
  0x26   : > { %561 = shalt.err (!%p558_p8)
}
  0x27   : > { %s665_s12 = smov 64   ;;  %s666_s13 = smov 4  }
  0x28   : > { %479 = dma.hbm_to_vmem [thread:$0]  (!%p747_p11), %s903_s2, 128, %s740_s25, [#allocation6], %s665_s12, %s665_s12, %s666_s13  }
  0x29   : > { %p26_p2 = scmp.eq.s32.totalorder %s25_s29, 0  ;;  %p35_p1 = scmp.ne.s32.totalorder %s658_s17, %s654_s16 }
  0x2a   : > { %p36_p4 = scmp.eq.s32.totalorder %s662_s18, 0  ;;  %p489_p6 = scmp.lt.s32.totalorder %s662_s18, 2 }
  0x2b   : > { %s783_s24 = scalar_select %p26_p2, %s658_s17, %s28_s28  }
  0x2c   : > { %p37_p8 = por %p36_p4, %p35_p1  ;;  %p913_p10 = scmp.eq.s32.totalorder %s717_s19, 1 }
  0x2d   : > { %s175_s5 = sand.u32 1, %s658_s17   ;;  %s447_s6 = sshll.u32 %s662_s18, 6 }
  0x2e   : > { %p787_p12 = por %p913_p10, %p35_p1  ;;  %s446_s7 = sshll.u32 %s175_s5, 2 }
  0x2f   : > { %s796_s9 = scalar_lea.hbm %s901_s0, %s447_s6  ;;  %s179_s25 = scalar_lea.vmem [#allocation2], %s446_s7 }
  0x30   : > { %s186_s28 = sshll.u32 %s179_s25, 4  ;;  %p798_p11 = pnand %p489_p6, %p37_p8  ;;  %s802_s28 = int_to_ptr.vmem [resolvable:$true] %s186_s28 }
  0x31   : > { %s176_s10 = scalar_lea.sflag [#allocation3], %s175_s5  ;;  %s562_s11 = scalar_lea.hbm %s796_s9, 64 }
  0x32   : > { %p563_p13 = scmp.ne.s32.totalorder %s796_s9, %s562_s11  ;;  %p564_p0 = pneg %p798_p11 }
  0x33   : > { %s567_s14 = scalar_lea.hbm %s901_s0, 128  ;;  %p568_p7 = scmp.lt.u32.totalorder %s796_s9, %s901_s0 }
  0x34   : > { %p565_p3 = pnand %p564_p0, %p563_p13  ;;  %p569_p9 = scmp.lt.u32.totalorder %s567_s14, %s562_s11 }
  0x35   : > { %p571_p1 = scmp.lt.u32.totalorder %s562_s11, %s796_s9 }
  0x36   : > { %p566_p5 = pneg %p565_p3  ;;  %p570_p2 = por %p569_p9, %p568_p7 }
  0x38   : > { %p572_p4 = por %p571_p1, %p570_p2 }
  0x3a   : > { %p573_p6 = pnand %p572_p4, %p566_p5 }
  0x3c   : > { %576 = shalt.err (!%p573_p6)
}
  0x3d   : > { %s577_s5 = scalar_lea.vmem %s802_s28, 64  ;;  %s667_s7 = smov [#allocation2]  }
  0x3e   : > { %p578_p8 = scmp.ne.s32.totalorder %s802_s28, %s577_s5  ;;  %s582_s26 = sshll.u32 %s667_s7, 4  ;;  %s583_s26 = int_to_ptr.vmem [resolvable:$false] %s582_s26 }
  0x3f   : > { %s584_s8 = scalar_lea.vmem %s583_s26, 128  ;;  %p585_p3 = scmp.lt.s32.totalorder %s802_s28, %s583_s26 }
  0x40   : > { %p580_p10 = pnand %p578_p8, %p564_p0  ;;  %p586_p7 = scmp.lt.s32.totalorder %s584_s8, %s577_s5 }
  0x42   : > { %p581_p13 = pneg %p580_p10  ;;  %p587_p9 = por %p586_p7, %p585_p3 }
  0x44   : > { %p588_p2 = pnand %p587_p9, %p581_p13 }
  0x46   : > { %591 = shalt.err (!%p588_p2)
}
  0x47   : > { %483 = dma.hbm_to_vmem [thread:$0]  (!%p798_p11), %s796_s9, 64, %s802_s28, %s176_s10  }
  0x48   : > { %p916_p5 = scmp.ne.s32.totalorder %s911_s23, 0 }
  0x49   : > { %s832_s25 = sand.u32 (!%p916_p5), 1, %s654_s16   ;;  %p917_p0 = scmp.ne.s32.totalorder (!%p916_p5), %s909_s21, 0 }
  0x4a   : > { %201 = sbr.rel (%p916_p5) target bundleno = 528 (0x210), region = 36  ;;  %s449_s11 = sshll.u32 (!%p916_p5), %s832_s25, 2 }
  0x4b   : > { %s204_s12 = scalar_lea.sflag (!%p916_p5), [#allocation3], %s832_s25  ;;  %s207_s13 = scalar_lea.vmem (!%p916_p5), [#allocation2], %s449_s11 }
  0x51   : > { %637 = dma.done.wait (%p917_p0), %s204_s12, 64  }
  0x52   : > { %639 = vsyncadd (%p917_p0), %s204_s12, 4294967232  ;;  %p918_p1 = scmp.eq.s32.totalorder %s717_s19, 0 }
  0x54   : > { %641 = dma.done.wait (%p918_p1), [#allocation6], 128   ;;  %p919_p11 = pmov %p918_p1 }
  0x55   : > { %v668_v0 = vmov 0.0   ;;  %vm669_vm0 = vmmov 0   ;;  %v529_v1 = vld [vmem:[#allocation5] sm:$0xff]   ;;  %v243_v2 = vld [vmem:[%s207_s13] sm:$0xf]  ;;  %vm252_vm1 = vcmask 130048  }
  0x56   : > { %643 = vsyncadd (%p919_p11), [#allocation6], 4294967168  ;;  %462 = vmatprep.subr.bf16.mxu0 %v668_v0  ;;  %464 = vmatprep.mubr.msk.bf16.mxu0 %vm669_vm0, %v668_v0  ;;  %p239_p4 = scmp.lt.s32.totalorder %s717_s19, 1  ;;  %v455_v5 = vld [vmem:[%s904_s3] ss:$0 sm:$0xff]  ;;  %s451_s14 = sshll.u32 %s832_s25, 3 }
  0x57   : > { %463 = vmatpush3.bf16.msra.mxu0 %v529_v1  ;;  %s457_s20 = sshll.u32 %s717_s19, 7  ;;  %s238_s6 = scalar_lea.vmem [#allocation7], %s451_s14 }
  0x58   : > { %s240_s21 = scalar_select %p239_p4, %s717_s19, 1 }
  0x59   : > { %s353_s5 = sshll.u32 %s238_s6, 4  ;;  %s857_s8 = scalar_lea.hbm %s905_s4, %s457_s20  ;;  %s859_s5 = int_to_ptr.vmem [resolvable:$true] %s353_s5 }
  0x5a   : > { %465 = vmatmul.mubr.msk.bf16.vlgmr.msra.gmra.mrb[0].mxu0 %vm252_vm1, %v243_v2  ;;  %s241_s28 = scalar_lea.vmem %s902_s1, %s240_s21  ;;  %s340_s11 = scalar_lea.sflag [#allocation4], %s832_s25 }
  0x5b   : > { %v454_v3 = vld [vmem:[%s241_s28] ss:$0 sm:$0xff]  ;;  %s592_s12 = scalar_lea.vmem %s859_s5, 128  ;;  %s670_s19 = smov [#allocation7]  }
  0x5c   : > { %p593_p6 = scmp.ne.s32.totalorder %s859_s5, %s592_s12  ;;  %s596_s13 = sshll.u32 %s670_s19, 4  ;;  %s597_s13 = int_to_ptr.vmem [resolvable:$false] %s596_s13 }
  0x5d   : > { %s598_s21 = scalar_lea.vmem %s597_s13, 256  ;;  %p599_p13 = scmp.lt.s32.totalorder %s859_s5, %s597_s13 }
  0x5e   : > { %p594_p8 = pnand %p593_p6, %p787_p12  ;;  %p600_p3 = scmp.lt.s32.totalorder %s598_s21, %s592_s12 }
  0x60   : > { %p595_p10 = pneg %p594_p8  ;;  %p601_p7 = por %p600_p3, %p599_p13 }
  0x62   : > { %p602_p9 = pnand %p601_p7, %p595_p10 }
 0x12d   : > { %v290_v4 = vpop.f32.mrb[0].mxu0 }
 0x12e   : > { %v303_v6 = vadd.f32 %v454_v3, %v290_v4  ;;  %v466_v7 = vpop.f32.mrb[1].mxu0 }
 0x12f   : > { %v293_v8 = vpop.f32.mrb[2].mxu0 }
 0x130   : > { %v467_v9 = vpop.f32.mrb[3].mxu0  ;;  %v311_v10 = vmul.f32 %v455_v5, %v303_v6 }
 0x132   : > { %312 = vadd.xlane.f32.xlu0 %v311_v10 }
 0x1bf   : > { %v313_v11 = vpop.xlane.xlu0 %312 }
 0x1c0   : > { %v314_v12 = vrot.slane %v313_v11, 4 }
 0x1c2   : > { %v315_v13 = vmax.f32 %v313_v11, %v314_v12 }
 0x1c4   : > { %v316_v14 = vrot.slane %v315_v13, 2 }
 0x1c6   : > { %v317_v15 = vmax.f32 %v315_v13, %v316_v14 }
 0x1c8   : > { %v318_v16 = vrot.slane %v317_v15, 1 }
 0x1ca   : > { %v319_v17 = vmax.f32 %v317_v15, %v318_v16 }
 0x1cc   : > { %v320_v18 = vsub.f32 %v313_v11, %v319_v17 }
 0x1ce   : > { %v321_v19 = vmul.f32 1.442695, %v320_v18 }
 0x1d0   : > { %530 = vpow2.f32 %v321_v19 }
 0x1da   : > { %v531_v20 = vpop.eup %530 }
 0x1db   : > { %v323_v21 = vrot.slane %v531_v20, 4 }
 0x1dd   : > { %v324_v22 = vadd.f32 %v531_v20, %v323_v21 }
 0x1df   : > { %v325_v23 = vrot.slane %v324_v22, 2 }
 0x1e1   : > { %v326_v24 = vadd.f32 %v325_v23, %v324_v22 }
 0x1e3   : > { %v327_v25 = vrot.slane %v326_v24, 1 }
 0x1e5   : > { %v328_v26 = vadd.f32 %v327_v25, %v326_v24 }
 0x1e7   : > { %532 = vrcp.f32 %v328_v26 }
 0x1f1   : > { %v533_v27 = vpop.eup %532 }
 0x1f2   : > { %v330_v28 = vmul.f32 %v533_v27, %v531_v20 }
 0x1f4   : > { %v331_v29 = vmul.f32 %v330_v28, %v303_v6 }
 0x1f6   : > { %v332_v30 = vrot.slane %v331_v29, 4 }
 0x1f8   : > { %v333_v31 = vadd.f32 %v332_v30, %v331_v29 }
 0x1fa   : > { %v334_v32 = vrot.slane %v333_v31, 2 }
 0x1fc   : > { %v335_v33 = vadd.f32 %v334_v32, %v333_v31 }
 0x1fe   : > { %v336_v34 = vrot.slane %v335_v33, 1 }
 0x200   : > { %v337_v35 = vadd.f32 %v336_v34, %v335_v33 }
 0x202   : > { %338 = vst [vmem:[%s238_s6] sm:$0xff] %v337_v35 }
 0x203   : > { %605 = shalt.err (!%p602_p9)
}
 0x204   : > { %s606_s25 = scalar_lea.hbm %s857_s8, 128  ;;  %s610_s28 = scalar_lea.hbm %s905_s4, 256 }
 0x205   : > { %p607_p2 = scmp.ne.s32.totalorder %s857_s8, %s606_s25  ;;  %p611_p1 = scmp.lt.u32.totalorder %s857_s8, %s905_s4 }
 0x206   : > { %p612_p11 = scmp.lt.u32.totalorder %s610_s28, %s606_s25  ;;  %p614_p6 = scmp.lt.u32.totalorder %s606_s25, %s857_s8 }
 0x207   : > { %p608_p5 = pnand %p607_p2, %p787_p12 }
 0x208   : > { %p613_p4 = por %p612_p11, %p611_p1 }
 0x209   : > { %p609_p0 = pneg %p608_p5 }
 0x20a   : > { %p615_p8 = por %p614_p6, %p613_p4 }
 0x20c   : > { %p616_p10 = pnand %p615_p8, %p609_p0 }
 0x20e   : > { %619 = shalt.err (!%p616_p10)
}
 0x20f   : > { %474 = dma.vmem_to_hbm [thread:$0]  (%p787_p12), %s859_s5, 128, %s857_s8, %s340_s11  }
 0x210 PF: > { %s365_s14 = sand.u32 1, %s650_s15   ;;  %p920_p13 = scmp.ne.s32.totalorder %s910_s22, 0 }
 0x211   : > { %p921_p3 = scmp.ge.s32.totalorder %s662_s18, 2  ;;  %s366_s20 = scalar_lea.sflag [#allocation4], %s365_s14 }
 0x213   : > { %p485_p7 = pnand %p921_p3, %p920_p13 }
 0x215   : > { %645 = dma.done.wait (!%p485_p7), %s366_s20, 128  }
 0x216   : > { %647 = vsyncadd (!%p485_p7), %s366_s20, 4294967168  ;;  %p18_p9 = scmp.ge.s32.totalorder %s752_s27, 4   ;;  %s922_s15 = smov %s654_s16 }
 0x217   : > { %s923_s16 = smov %s658_s17  ;;  %s924_s17 = smov %s783_s24 }
 0x218   : > { %s925_s18 = smov %s752_s27  ;;  %20 = sbr.rel (!%p18_p9) target bundleno = 6 (0x6), region = 88 }
 0x21f   :  { %371 = vsyncpa [#allocation3], 1 }
 0x220   :  { %373 = vsyncpa [#allocation3 + $0x1], 1 }
 0x221   :  { %374 = vsyncpa [#allocation6], 1 }
 0x222   :  { %375 = vsyncpa [#allocation4], 1 }
 0x223   :  { %377 = vsyncpa [#allocation4 + $0x1], 1 }

</bundles_post_ra>
